<compile_context>
chip_gen: v7x
topology: tpu7x:2x2x1
jax: 0.10.0
libtpu: 0.0.40
codegen_flags: <defaults>
</compile_context>

<pallas_src>
import functools
import math

import jax
import jax.numpy as jnp
from jax.experimental import pallas as pl
from jax.experimental.pallas import tpu as pltpu


# --------------------------------------------------------------------------
# Kernels
# --------------------------------------------------------------------------
def _grn_fused_kernel(x_ref, gamma_ref, beta_ref, o_ref, *, eps, c, pack):
    # x_ref: (1, HWp, Cp) with Cp = pack*c (lane-packed view of the NHWC slab)
    # gamma_ref / beta_ref: (1, Cp) float32, pre-tiled to the packed width.
    xf = x_ref[0].astype(jnp.float32)                        # (HWp, Cp)
    ssq = jnp.sum(xf * xf, axis=0, keepdims=True)            # (1, Cp)  f32

    # Fold the `pack` interleaved channel groups so every lane ends up holding
    # its channel's total sum of squares: log2(pack) lane rotations on the XLU
    # (free bundle slot).  Exact because pack*c is the full lane width.
    rep = ssq
    shift = c
    while shift < pack * c:
        rep = rep + pltpu.roll(rep, shift, 1)
        shift *= 2

    gx = jnp.sqrt(rep)                                       # per-channel L2, replicated
    # Every channel appears exactly `pack` times -> lane mean == channel mean.
    nx = gx / (jnp.mean(gx, axis=-1, keepdims=True) + eps)   # (1, Cp)
    scale = gamma_ref[...] * nx + 1.0                        # (1, Cp) f32
    o_ref[0] = (xf * scale + beta_ref[...]).astype(o_ref.dtype)


def _grn_sumsq_kernel(x_ref, ssq_ref, *, hw, tile_rows):
    # x_ref: (1, TH, Cp)   ssq_ref: (1, 1, Cp) f32 accumulator (revisited over t)
    t = pl.program_id(1)

    @pl.when(t == 0)
    def _():
        ssq_ref[...] = jnp.zeros_like(ssq_ref)

    xf = x_ref[0].astype(jnp.float32)                                   # (TH, Cp)
    row = jax.lax.broadcasted_iota(jnp.int32, (tile_rows, 1), 0) + t * tile_rows
    xf = jnp.where(row < hw, xf, 0.0)                                   # mask edge rows
    ssq_ref[...] += jnp.sum(xf * xf, axis=0, keepdims=True)[None]


def _grn_apply_kernel(x_ref, scale_ref, beta_ref, o_ref):
    # x_ref: (1, TH, Cp)   scale_ref: (1, 1, Cp) f32   beta_ref: (1, Cp) f32
    xf = x_ref[0].astype(jnp.float32)
    y = xf * scale_ref[0] + beta_ref[...]
    o_ref[0] = y.astype(o_ref.dtype)


# --------------------------------------------------------------------------
# Helpers
# --------------------------------------------------------------------------
def _pack_factor(hw, c, max_lanes=4096):
    """Lane-packing factor k: view (HW, C) as (HW/k, k*C) with k*C % 128 == 0."""
    if c % 128 == 0:
        return 1
    k = 128 // math.gcd(c, 128)          # smallest power-of-2 k with k*C % 128 == 0
    if hw % k != 0 or k * c > max_lanes:
        return 1
    # Widen a bit further (still lane-dense) while keeping >= 8 rows.
    while k * c < 512 and hw % (2 * k) == 0 and (hw // (2 * k)) >= 8:
        k *= 2
    return k


def _pick_tile_rows(hw, c, itemsize, budget_bytes):
    # Live bytes per tile-row: double-buffered input+output (2+2)*itemsize
    # plus an f32 intermediate.
    th = budget_bytes // max(1, c * (4 * itemsize + 4))
    th = int(min(th, hw, 4096))
    if th >= hw:
        return hw
    th = max(32, (th // 32) * 32)   # multiple of 32: safe sublane tiling f32/bf16/i8
    return min(th, hw)


# --------------------------------------------------------------------------
# Wrapper
# --------------------------------------------------------------------------
def grn_nhwc(x, gamma, beta=None, *, eps=1e-6,
             force_tiled=False, tile_rows=None,
             fused_vmem_budget_bytes=28 << 20,
             tiled_vmem_budget_bytes=8 << 20):
    """Pallas TPU forward of GRNwithNHWC. x: (N, H, W, C); gamma/beta: (C,)-like."""
    n, h, w, c = x.shape
    hw = h * w
    itemsize = x.dtype.itemsize

    # Lane packing: free reshape of the contiguous NHWC slab.
    k = _pack_factor(hw, c)
    c_p = k * c
    hw_p = hw // k
    x3 = jnp.reshape(x, (n, hw_p, c_p))

    # Params: cast to f32 once and pre-tile to the packed lane width.
    gamma_p = jnp.tile(jnp.reshape(gamma, (1, c)).astype(jnp.float32), (1, k))
    if beta is None:                                        # use_bias=False
        beta_p = jnp.zeros((1, c_p), jnp.float32)
    else:
        beta_p = jnp.tile(jnp.reshape(beta, (1, c)).astype(jnp.float32), (1, k))

    # Fused-path live VMEM: in/out double-buffered slabs + f32 intermediate.
    fused_bytes = hw * c * (4 * itemsize + 4)
    use_fused = (not force_tiled) and fused_bytes <= fused_vmem_budget_bytes

    if use_fused:
        vmem_limit = int(min(max(fused_bytes + (8 << 20), 16 << 20), 48 << 20))
        out3 = pl.pallas_call(
            functools.partial(_grn_fused_kernel, eps=eps, c=c, pack=k),
            out_shape=jax.ShapeDtypeStruct((n, hw_p, c_p), x.dtype),
            grid_spec=pltpu.PrefetchScalarGridSpec(
                num_scalar_prefetch=0,
                grid=(n,),
                in_specs=[
                    pl.BlockSpec((1, hw_p, c_p), lambda b: (b, 0, 0)),
                    pl.BlockSpec((1, c_p), lambda b: (0, 0)),
                    pl.BlockSpec((1, c_p), lambda b: (0, 0)),
                ],
                out_specs=pl.BlockSpec((1, hw_p, c_p), lambda b: (b, 0, 0)),
            ),
            compiler_params=pltpu.CompilerParams(
                dimension_semantics=("parallel",),
                vmem_limit_bytes=vmem_limit,
            ),
            cost_estimate=pl.CostEstimate(
                flops=4 * n * hw * c,
                transcendentals=n * c,
                bytes_accessed=2 * n * hw * c * itemsize + 2 * c_p * 4,
            ),
        )(x3, gamma_p, beta_p)
        return jnp.reshape(out3, (n, h, w, c))

    # ---- Tiled two-pass fallback: bounded VMEM, spatial tiling over H*W ----
    th = int(tile_rows) if tile_rows is not None else _pick_tile_rows(
        hw_p, c_p, itemsize, tiled_vmem_budget_bytes)
    n_tiles = pl.cdiv(hw_p, th)
    vmem_limit = int(min(max(th * c_p * (4 * itemsize + 4) + (8 << 20), 16 << 20),
                         48 << 20))

    # Pass 1: per-(image, packed-channel) sum of squares, accumulated in f32.
    ssq_p = pl.pallas_call(
        functools.partial(_grn_sumsq_kernel, hw=hw_p, tile_rows=th),
        out_shape=jax.ShapeDtypeStruct((n, 1, c_p), jnp.float32),
        grid_spec=pltpu.PrefetchScalarGridSpec(
            num_scalar_prefetch=0,
            grid=(n, n_tiles),
            in_specs=[pl.BlockSpec((1, th, c_p), lambda b, t: (b, t, 0))],
            out_specs=pl.BlockSpec((1, 1, c_p), lambda b, t: (b, 0, 0)),
        ),
        compiler_params=pltpu.CompilerParams(
            dimension_semantics=("parallel", "arbitrary"),
            vmem_limit_bytes=vmem_limit,
        ),
        cost_estimate=pl.CostEstimate(
            flops=2 * n * hw * c, transcendentals=0,
            bytes_accessed=n * hw * c * itemsize + n * c_p * 4,
        ),
    )(x3)

    # Tiny (N, C) epilogue in plain XLA: fold packed groups, norm, channel
    # mean, per-channel scale; re-tile scale to the packed lane width.
    ssq = jnp.sum(jnp.reshape(ssq_p, (n, 1, k, c)), axis=2)        # (N,1,C)
    gx = jnp.sqrt(ssq)
    nx = gx / (jnp.mean(gx, axis=-1, keepdims=True) + eps)
    scale = gamma_p[None, :, :c] * nx + 1.0                        # (N,1,C) f32
    scale_p = jnp.tile(scale, (1, 1, k))                           # (N,1,Cp)

    # Pass 2: apply scale + bias, fully parallel grid.
    out3 = pl.pallas_call(
        _grn_apply_kernel,
        out_shape=jax.ShapeDtypeStruct((n, hw_p, c_p), x.dtype),
        grid_spec=pltpu.PrefetchScalarGridSpec(
            num_scalar_prefetch=0,
            grid=(n, n_tiles),
            in_specs=[
                pl.BlockSpec((1, th, c_p), lambda b, t: (b, t, 0)),
                pl.BlockSpec((1, 1, c_p), lambda b, t: (b, 0, 0)),
                pl.BlockSpec((1, c_p), lambda b, t: (0, 0)),
            ],
            out_specs=pl.BlockSpec((1, th, c_p), lambda b, t: (b, t, 0)),
        ),
        compiler_params=pltpu.CompilerParams(
            dimension_semantics=("parallel", "parallel"),
            vmem_limit_bytes=vmem_limit,
        ),
        cost_estimate=pl.CostEstimate(
            flops=2 * n * hw * c, transcendentals=0,
            bytes_accessed=2 * n * hw * c * itemsize + n * c_p * 4,
        ),
    )(x3, scale_p, beta_p)
    return jnp.reshape(out3, (n, h, w, c))


# --------------------------------------------------------------------------
# Test
# --------------------------------------------------------------------------
if __name__ == "__main__":
    key = jax.random.PRNGKey(0)
    kx, kg, kb, kx2 = jax.random.split(key, 4)

    N, H, W, C = 2, 16, 16, 4
    x = jax.random.normal(kx, (N, H, W, C), dtype=jnp.float32)
    gamma = 0.1 * jax.random.normal(kg, (C,), dtype=jnp.float32)
    beta = 0.1 * jax.random.normal(kb, (C,), dtype=jnp.float32)

    def reference(xr, g, b, eps=1e-6):
        xf = xr.astype(jnp.float32)
        gx = jnp.sqrt(jnp.sum(xf * xf, axis=(1, 2), keepdims=True))   # (N,1,1,C)
        nx = gx / (jnp.mean(gx, axis=-1, keepdims=True) + eps)
        y = (g.reshape(1, 1, 1, -1) * nx + 1.0) * xf + b.reshape(1, 1, 1, -1)
        return y.astype(xr.dtype)

    # Primary fused path (whole-image block, lane-packed: C=4 -> 128 lanes).
    out = jax.block_until_ready(grn_nhwc(x, gamma, beta))
    ref = reference(x, gamma, beta)
    assert out.shape == (N, H, W, C) and out.dtype == x.dtype
    assert jnp.allclose(out, ref, rtol=1e-5, atol=1e-5), "fused path mismatch"

    # Tiled two-pass fallback (forced, small row tile, non-divisible H*W ->
    # exercises the accumulator and the edge-row masking; packing disabled
    # automatically because 225 % 32 != 0).
    x2 = jax.random.normal(kx2, (N, 15, 15, C), dtype=jnp.float32)
    out2 = jax.block_until_ready(
        grn_nhwc(x2, gamma, beta, force_tiled=True, tile_rows=64))
    ref2 = reference(x2, gamma, beta)
    assert jnp.allclose(out2, ref2, rtol=1e-5, atol=1e-5), "tiled path mismatch"

    # use_bias=False variant.
    out3 = jax.block_until_ready(grn_nhwc(x, gamma, beta=None))
    ref3 = reference(x, gamma, jnp.zeros((C,), jnp.float32))
    assert jnp.allclose(out3, ref3, rtol=1e-5, atol=1e-5), "no-bias path mismatch"

    print("KERNEL_OK")
</pallas_src>

<mosaic_0001>
module attributes {stable_mosaic.version = 11 : i64} {
  func.func @_grn_fused_kernel(%arg0: i32, %arg1: memref<1x8x128xf32, #tpu.memory_space<vmem>>, %arg2: memref<1x128xf32, #tpu.memory_space<vmem>>, %arg3: memref<1x128xf32, #tpu.memory_space<vmem>>, %arg4: memref<1x8x128xf32, #tpu.memory_space<vmem>>) attributes {dimension_semantics = [#tpu.dimension_semantics<parallel>], iteration_bounds = array<i64: 2>, scalar_prefetch = 0 : i64, scratch_operands = 0 : i64, tpu.core_type = #tpu.core_type<tc>, window_params = [{transform_indices = @transform_0, window_bounds = array<i64: 1, 8, 128>}, {pipeline_mode = #tpu.pipeline_mode<synchronous>, transform_indices = @transform_1, window_bounds = array<i64: 1, 128>}, {pipeline_mode = #tpu.pipeline_mode<synchronous>, transform_indices = @transform_2, window_bounds = array<i64: 1, 128>}, {transform_indices = @transform_3, window_bounds = array<i64: 1, 8, 128>}]} {
    %c0 = arith.constant 0 : index
    %c0_0 = arith.constant 0 : index
    %c0_1 = arith.constant 0 : index
    %0 = vector.load %arg1[%c0, %c0_0, %c0_1] : memref<1x8x128xf32, #tpu.memory_space<vmem>>, vector<1x8x128xf32>
    %1 = vector.shape_cast %0 : vector<1x8x128xf32> to vector<8x128xf32>
    %2 = arith.mulf %1, %1 : vector<8x128xf32>
    %cst = arith.constant dense<0.000000e+00> : vector<128xf32>
    %3 = vector.multi_reduction <add>, %2, %cst [0] : vector<8x128xf32> to vector<128xf32>
    %4 = vector.shape_cast %3 : vector<128xf32> to vector<1x128xf32>
    %c4_i32 = arith.constant 4 : i32
    %5 = tpu.dynamic_rotate %4 by %c4_i32 dim 1 : vector<1x128xf32>, i32 -> vector<1x128xf32>
    %6 = arith.addf %4, %5 : vector<1x128xf32>
    %c8_i32 = arith.constant 8 : i32
    %7 = tpu.dynamic_rotate %6 by %c8_i32 dim 1 : vector<1x128xf32>, i32 -> vector<1x128xf32>
    %8 = arith.addf %6, %7 : vector<1x128xf32>
    %c16_i32 = arith.constant 16 : i32
    %9 = tpu.dynamic_rotate %8 by %c16_i32 dim 1 : vector<1x128xf32>, i32 -> vector<1x128xf32>
    %10 = arith.addf %8, %9 : vector<1x128xf32>
    %c32_i32 = arith.constant 32 : i32
    %11 = tpu.dynamic_rotate %10 by %c32_i32 dim 1 : vector<1x128xf32>, i32 -> vector<1x128xf32>
    %12 = arith.addf %10, %11 : vector<1x128xf32>
    %c64_i32 = arith.constant 64 : i32
    %13 = tpu.dynamic_rotate %12 by %c64_i32 dim 1 : vector<1x128xf32>, i32 -> vector<1x128xf32>
    %14 = arith.addf %12, %13 : vector<1x128xf32>
    %15 = math.sqrt %14 : vector<1x128xf32>
    %cst_2 = arith.constant dense<0.000000e+00> : vector<1xf32>
    %16 = vector.multi_reduction <add>, %15, %cst_2 [1] : vector<1x128xf32> to vector<1xf32>
    %17 = vector.shape_cast %16 : vector<1xf32> to vector<1x1xf32>
    %cst_3 = arith.constant 1.280000e+02 : f32
    %18 = vector.broadcast %cst_3 : f32 to vector<1x1xf32>
    %19 = arith.divf %17, %18 : vector<1x1xf32>
    %cst_4 = arith.constant 9.99999997E-7 : f32
    %20 = vector.broadcast %cst_4 : f32 to vector<1x1xf32>
    %21 = arith.addf %19, %20 : vector<1x1xf32>
    %22 = vector.broadcast %21 : vector<1x1xf32> to vector<1x128xf32>
    %23 = arith.divf %15, %22 : vector<1x128xf32>
    %c0_5 = arith.constant 0 : index
    %c0_6 = arith.constant 0 : index
    %24 = vector.load %arg2[%c0_5, %c0_6] : memref<1x128xf32, #tpu.memory_space<vmem>>, vector<1x128xf32>
    %25 = arith.mulf %24, %23 : vector<1x128xf32>
    %cst_7 = arith.constant 1.000000e+00 : f32
    %26 = vector.broadcast %cst_7 : f32 to vector<1x128xf32>
    %27 = arith.addf %25, %26 : vector<1x128xf32>
    %28 = vector.broadcast %27 : vector<1x128xf32> to vector<8x128xf32>
    %29 = arith.mulf %1, %28 : vector<8x128xf32>
    %c0_8 = arith.constant 0 : index
    %c0_9 = arith.constant 0 : index
    %30 = vector.load %arg3[%c0_8, %c0_9] : memref<1x128xf32, #tpu.memory_space<vmem>>, vector<1x128xf32>
    %31 = vector.broadcast %30 : vector<1x128xf32> to vector<8x128xf32>
    %32 = arith.addf %29, %31 : vector<8x128xf32>
    %c0_10 = arith.constant 0 : index
    %c0_11 = arith.constant 0 : index
    %c0_12 = arith.constant 0 : index
    %33 = vector.load %arg4[%c0_10, %c0_11, %c0_12] : memref<1x8x128xf32, #tpu.memory_space<vmem>>, vector<1x8x128xf32>
    %34 = vector.shape_cast %33 : vector<1x8x128xf32> to vector<8x128xf32>
    %35 = vector.shape_cast %32 : vector<8x128xf32> to vector<1x8x128xf32>
    tpu.vector_store %arg4[%c0_10, %c0_11, %c0_12], %35 {strides = array<i32>} : memref<1x8x128xf32, #tpu.memory_space<vmem>>, vector<1x8x128xf32>,
    return
  }
  func.func @transform_0(%arg0: i32) -> (i32, i32, i32) {
    %c0_i32 = arith.constant 0 : i32
    %c0_i32_0 = arith.constant 0 : i32
    %c0_i32_1 = arith.constant 0 : i32
    return %arg0, %c0_i32, %c0_i32_0 : i32, i32, i32
  }
  func.func @transform_1(%arg0: i32) -> (i32, i32) {
    %c0_i32 = arith.constant 0 : i32
    %c0_i32_0 = arith.constant 0 : i32
    %c0_i32_1 = arith.constant 0 : i32
    return %c0_i32, %c0_i32_0 : i32, i32
  }
  func.func @transform_2(%arg0: i32) -> (i32, i32) {
    %c0_i32 = arith.constant 0 : i32
    %c0_i32_0 = arith.constant 0 : i32
    %c0_i32_1 = arith.constant 0 : i32
    return %c0_i32, %c0_i32_0 : i32, i32
  }
  func.func @transform_3(%arg0: i32) -> (i32, i32, i32) {
    %c0_i32 = arith.constant 0 : i32
    %c0_i32_0 = arith.constant 0 : i32
    %c0_i32_1 = arith.constant 0 : i32
    return %arg0, %c0_i32, %c0_i32_0 : i32, i32, i32
  }
}

</mosaic_0001>

<bundles_post_ra>
// kernel: tpu_custom_call.1
= control target key start
LH: loop header
LB: loop body
LE: loop exit
PB: predicated region body
PF: predicated region fallthrough
CT: control target
= control target key end

     0   :  { %8 = vsyncpa [#allocation3], 0  ;;  %s692_s0 = inlined_call_operand.hbm [shape: f32[2,8,128], index: 0, kind: input, shape index: {}]   ;;  %s693_s1 = inlined_call_operand.vmem [shape: f32[1,128], index: 1, kind: input, shape index: {}]   ;;  %s694_s2 = inlined_call_operand.vmem [shape: f32[1,128], index: 2, kind: input, shape index: {}]   ;;  %s695_s3 = inlined_call_operand.hbm [shape: f32[2,8,128], index: 3, kind: output, shape index: {}]  }
   0x1   :  { %10 = vsyncpa [#allocation3 + $0x1], 0 }
   0x2   :  { %11 = vsyncpa [#allocation4], 0 }
   0x3   :  { %13 = vsyncpa [#allocation4 + $0x1], 0  ;;  %s521_s12 = smov 0   ;;  %s523_s13 = smov 0  }
   0x4   :  { %s525_s14 = smov 0   ;;  %s527_s15 = smov 0  }
   0x5 LB: > { %s542_s16 = sadd.s32 4294967295, %s492_s15   ;;  %s328_s17 = sadd.s32 4294967294, %s492_s15   ;;  %s492_s15 = sphi %s527_s15, %s710_s15   ;;  %s488_s14 = sphi %s525_s14, %s709_s14   ;;  %s484_s13 = sphi %s523_s13, %s708_s13   ;;  %s480_s12 = sphi %s521_s12, %s707_s12  }
   0x6   : > { %s546_s18 = sadd.s32 1, %s492_s15   ;;  %s26_s19 = sadd.s32 1, %s488_s14 }
   0x7   : > { %s23_s20 = ssub.s32 %s492_s15, %s546_s18  ;;  %p33_p0 = scmp.ne.s32.totalorder %s488_s14, %s484_s13 }
   0x8   : > { %p24_p1 = scmp.eq.s32.totalorder %s23_s20, 0  ;;  %p34_p2 = scmp.eq.s32.totalorder %s492_s15, 0 }
   0x9   : > { %p39_p3 = scmp.ne.s32.totalorder %s484_s13, %s480_s12  ;;  %p40_p4 = scmp.eq.s32.totalorder %s542_s16, 0 }
   0xa   : > { %s558_s21 = scalar_select %p24_p1, %s488_s14, %s26_s19  }
   0xb   : > { %p560_p5 = por %p34_p2, %p33_p0  ;;  %p564_p6 = por %p40_p4, %p39_p3 }
   0xc   : > { %p105_p7 = scmp.eq.s32.totalorder %s542_s16, 1  ;;  %p111_p8 = scmp.eq.s32.totalorder %s328_s17, 1 }
   0xd   : > { %p353_p10 = scmp.lt.s32.totalorder %s492_s15, 2  ;;  %s137_s26 = sand.u32 1, %s488_s14  }
   0xe   : > { %p571_p11 = por %p105_p7, %p33_p0  ;;  %p575_p12 = por %p111_p8, %p39_p3 }
   0xf   : > { %s332_s27 = sshll.u32 %s492_s15, 7  ;;  %s331_s28 = sshll.u32 %s137_s26, 3 }
  0x10   : > { %s699_s24 = scalar_select %p571_p11, 1, 0 }
  0x11   : > { %s700_s25 = scalar_select %p575_p12, 1, 0 }
  0x12   : > { %s584_s4 = scalar_lea.hbm %s692_s0, %s332_s27  ;;  %s141_s5 = scalar_lea.vmem [#allocation2], %s331_s28 }
  0x13   : > { %s148_s6 = sshll.u32 %s141_s5, 4  ;;  %p588_p13 = pnand %p353_p10, %p560_p5  ;;  %s592_s6 = int_to_ptr.vmem [resolvable:$true] %s148_s6 }
  0x14   : > { %s138_s8 = scalar_lea.sflag [#allocation3], %s137_s26  ;;  %s396_s9 = scalar_lea.hbm %s584_s4, 128 }
  0x15   : > { %p397_p2 = scmp.ne.s32.totalorder %s584_s4, %s396_s9  ;;  %p398_p3 = pneg %p588_p13 }
  0x16   : > { %s401_s17 = scalar_lea.hbm %s692_s0, 256  ;;  %p402_p5 = scmp.lt.u32.totalorder %s584_s4, %s692_s0 }
  0x17   : > { %p399_p4 = pnand %p398_p3, %p397_p2  ;;  %p403_p8 = scmp.lt.u32.totalorder %s401_s17, %s396_s9 }
  0x18   : > { %p405_p9 = scmp.lt.u32.totalorder %s396_s9, %s584_s4 }
  0x19   : > { %p400_p7 = pneg %p399_p4  ;;  %p404_p10 = por %p403_p8, %p402_p5 }
  0x1b   : > { %p406_p0 = por %p405_p9, %p404_p10 }
  0x1d   : > { %p407_p1 = pnand %p406_p0, %p400_p7 }
  0x1f   : > { %410 = shalt.err (!%p407_p1)
}
  0x20   : > { %s411_s22 = scalar_lea.vmem %s592_s6, 128  ;;  %s494_s26 = smov [#allocation2]  }
  0x21   : > { %p412_p2 = scmp.ne.s32.totalorder %s592_s6, %s411_s22  ;;  %s416_s27 = sshll.u32 %s494_s26, 4  ;;  %s417_s27 = int_to_ptr.vmem [resolvable:$false] %s416_s27 }
  0x22   : > { %s418_s28 = scalar_lea.vmem %s417_s27, 256  ;;  %p419_p11 = scmp.lt.s32.totalorder %s592_s6, %s417_s27 }
  0x23   : > { %p414_p4 = pnand %p412_p2, %p398_p3  ;;  %p420_p5 = scmp.lt.s32.totalorder %s418_s28, %s411_s22 }
  0x25   : > { %p415_p12 = pneg %p414_p4  ;;  %p421_p8 = por %p420_p5, %p419_p11 }
  0x27   : > { %p422_p9 = pnand %p421_p8, %p415_p12 }
  0x29   : > { %425 = shalt.err (!%p422_p9)
}
  0x2a   : > { %348 = dma.hbm_to_vmem [thread:$0]  (!%p588_p13), %s584_s4, 128, %s592_s6, %s138_s8  }
  0x2b   : > { %p702_p0 = scmp.lt.s32.totalorder %s492_s15, 3  ;;  %p703_p1 = scmp.ge.s32.totalorder %s492_s15, 1 }
  0x2d   : > { %p154_p3 = pnand %p703_p1, %p702_p0 }
  0x2e   : > { %s626_s29 = sand.u32 (!%p154_p3), 1, %s484_s13  }
  0x2f   : > { %157 = sbr.rel (%p154_p3) target bundleno = 854 (0x356), region = 32  ;;  %s334_s30 = sshll.u32 (!%p154_p3), %s626_s29, 3 }
  0x30   : > { %s160_s5 = scalar_lea.sflag (!%p154_p3), [#allocation3], %s626_s29  ;;  %s163_s7 = scalar_lea.vmem (!%p154_p3), [#allocation2], %s334_s30 }
  0x36   : > { %471 = dma.done.wait (%p564_p6), %s160_s5, 128  }
  0x37   : > { %473 = vsyncadd (%p564_p6), %s160_s5, 4294967168  ;;  %v186_v0 = vld [vmem:[%s163_s7] sm:$0xff]  ;;  %s495_s4 = smov 4   ;;  %s496_s6 = smov 8   ;;  %vm216_vm1 = vcmask 1040384   ;;  %v229_v27 = vlaneseq }
  0x38   : > { %v187_v1 = vmul.f32 %v186_v0, %v186_v0  ;;  %s497_s8 = smov 16   ;;  %s498_s23 = smov 32   ;;  %v225_v30 = vld [vmem:[%s693_s1] sm:$0x1] }
  0x39   : > { %s499_s9 = smov 64   ;;  %v230_v28 = vshrl.u32 %v229_v27, 7  ;;  %v336_v36 = vld [vmem:[%s694_s2] ss:$0 sm:$0xff]  ;;  %s338_s20 = sshll.u32 %s542_s16, 7 }
  0x3a   : > { %v188_v2 = vrot.slane %v187_v1, 4  ;;  %s185_s22 = scalar_lea.vmem [#allocation5], %s334_s30  ;;  %s648_s5 = scalar_lea.hbm %s695_s3, %s338_s20 }
  0x3b   : > { %v231_v33 = vsub.s32 0, %v230_v28  ;;  %s258_s26 = sshll.u32 %s185_s22, 4  ;;  %s245_s7 = scalar_lea.sflag [#allocation4], %s626_s29  ;;  %s650_s26 = int_to_ptr.vmem [resolvable:$true] %s258_s26 }
  0x3c   : > { %v189_v3 = vadd.f32 %v188_v2, %v187_v1  ;;  %p704_p11 = scmp.ne.s32.totalorder %s699_s24, 0  ;;  %s500_s16 = smov [#allocation5]  }
  0x3d   : > { %s430_s30 = sshll.u32 %s500_s16, 4  ;;  %s431_s30 = int_to_ptr.vmem [resolvable:$false] %s430_s30 }
  0x3e   : > { %v190_v4 = vrot.slane %v189_v3, 2  ;;  %p433_p7 = scmp.lt.s32.totalorder %s650_s26, %s431_s30 }
  0x40   : > { %v191_v5 = vadd.f32 %v190_v4, %v189_v3 }
  0x42   : > { %v192_v6 = vrot.slane %v191_v5, 1 }
  0x44   : > { %v193_v7 = vadd.f32 %v192_v6, %v191_v5 }
  0x46   : > { %194 = vrot.lane.b32.xlu0 %v193_v7, %s495_s4  ;;  %s426_s4 = scalar_lea.vmem %s650_s26, 128 }
  0x47   : > { %p427_p6 = scmp.ne.s32.totalorder %s650_s26, %s426_s4 }
  0x49   : > { %p428_p12 = pnand %p427_p6, %p704_p11 }
  0x4b   : > { %p429_p13 = pneg %p428_p12 }
  0xb8   : > { %v195_v8 = vpop.permute.xlu0 %194 }
  0xb9   : > { %v196_v9 = vadd.f32 %v195_v8, %v193_v7 }
  0xbb   : > { %197 = vrot.lane.b32.xlu0 %v196_v9, %s496_s6  ;;  %s432_s6 = scalar_lea.vmem %s431_s30, 256 }
  0xbc   : > { %p434_p10 = scmp.lt.s32.totalorder %s432_s6, %s426_s4 }
  0xbe   : > { %p435_p2 = por %p434_p10, %p433_p7 }
  0xc0   : > { %p436_p4 = pnand %p435_p2, %p429_p13 }
 0x12d   : > { %v198_v10 = vpop.permute.xlu0 %197 }
 0x12e   : > { %v199_v11 = vadd.f32 %v198_v10, %v196_v9 }
 0x130   : > { %200 = vrot.lane.b32.xlu1 %v199_v11, %s497_s8 }
 0x1a2   : > { %v201_v12 = vpop.permute.xlu1 %200 }
 0x1a3   : > { %v202_v13 = vadd.f32 %v201_v12, %v199_v11 }
 0x1a5   : > { %203 = vrot.lane.b32.xlu1 %v202_v13, %s498_s23 }
 0x217   : > { %v204_v14 = vpop.permute.xlu1 %203 }
 0x218   : > { %v205_v15 = vadd.f32 %v204_v14, %v202_v13 }
 0x21a   : > { %206 = vrot.lane.b32.xlu0 %v205_v15, %s499_s9 }
 0x28c   : > { %v207_v16 = vpop.permute.xlu0 %206 }
 0x28d   : > { %v208_v17 = vadd.f32 %v207_v16, %v205_v15 }
 0x28f   : > { %392 = vrsqrt.f32 %v208_v17  ;;  %vm211_vm0 = vcmp.eq.f32.partialorder %v208_v17, inf  ;;  %v214_v20 = vand.u32 2147483648, %v208_v17  ;;  %vm213_vm2 = vcmp.eq.f32.partialorder %v208_v17, 0.0 }
 0x299   : > { %v393_v18 = vpop.eup %392 }
 0x29a   : > { %v210_v19 = vmul.f32 %v393_v18, %v208_v17 }
 0x29c   : > { %v212_v21 = vsel %vm211_vm0, %v208_v17, %v210_v19 }
 0x29d   : > { %v215_v22 = vsel %vm213_vm2, %v214_v20, %v212_v21 }
 0x29e   : > { %v217_v23 = vsel %vm216_vm1, %v215_v22, 0.0 }
 0x29f   : > { %218 = vadd.xlane.f32.xlu1 %v217_v23 }
 0x32c   : > { %v219_v24 = vpop.xlane.xlu1 %218 }
 0x32d   : > { %v221_v25 = vmul.f32 0.0078125, %v219_v24 }
 0x32f   : > { %v222_v26 = vadd.f32 1e-06, %v221_v25 }
 0x331   : > { %394 = vrcp.f32 %v222_v26 }
 0x33b   : > { %v395_v29 = vpop.eup %394 }
 0x33c   : > { %v224_v31 = vmul.f32 %v395_v29, %v215_v22 }
 0x33e   : > { %v226_v32 = vmul.f32 %v225_v30, %v224_v31 }
 0x340   : > { %v227_v34 = vadd.f32 1.0, %v226_v32 }
 0x342   : > { %v232_v35 = vrot.slane %v227_v34, %v231_v33 }
 0x344   : > { %v234_v37 = vmul.f32 %v232_v35, %v186_v0 }
 0x346   : > { %v242_v38 = vadd.f32 %v336_v36, %v234_v37 }
 0x348   : > { %243 = vst [vmem:[%s185_s22] sm:$0xff] %v242_v38 }
 0x349   : > { %439 = shalt.err (!%p436_p4)
}
 0x34a   : > { %s440_s29 = scalar_lea.hbm %s648_s5, 128  ;;  %s444_s9 = scalar_lea.hbm %s695_s3, 256 }
 0x34b   : > { %p441_p5 = scmp.ne.s32.totalorder %s648_s5, %s440_s29  ;;  %p445_p0 = scmp.lt.u32.totalorder %s648_s5, %s695_s3 }
 0x34c   : > { %p446_p1 = scmp.lt.u32.totalorder %s444_s9, %s440_s29  ;;  %p448_p6 = scmp.lt.u32.totalorder %s440_s29, %s648_s5 }
 0x34d   : > { %p442_p8 = pnand %p441_p5, %p704_p11 }
 0x34e   : > { %p447_p3 = por %p446_p1, %p445_p0 }
 0x34f   : > { %p443_p9 = pneg %p442_p8 }
 0x350   : > { %p449_p12 = por %p448_p6, %p447_p3 }
 0x352   : > { %p450_p13 = pnand %p449_p12, %p443_p9 }
 0x354   : > { %453 = shalt.err (!%p450_p13)
}
 0x355   : > { %343 = dma.vmem_to_hbm [thread:$0]  (%p704_p11), %s650_s26, 128, %s648_s5, %s245_s7  }
 0x356 PF: > { %s270_s17 = sand.u32 1, %s480_s12   ;;  %p705_p7 = scmp.ne.s32.totalorder %s700_s25, 0 }
 0x357   : > { %p706_p10 = scmp.ge.s32.totalorder %s492_s15, 2  ;;  %s271_s19 = scalar_lea.sflag [#allocation4], %s270_s17 }
 0x359   : > { %p350_p2 = pnand %p706_p10, %p705_p7 }
 0x35b   : > { %475 = dma.done.wait (!%p350_p2), %s271_s19, 128  }
 0x35c   : > { %477 = vsyncadd (!%p350_p2), %s271_s19, 4294967168  ;;  %p16_p4 = scmp.ge.s32.totalorder %s546_s18, 4   ;;  %s707_s12 = smov %s484_s13 }
 0x35d   : > { %s708_s13 = smov %s488_s14  ;;  %s709_s14 = smov %s558_s21 }
 0x35e   : > { %s710_s15 = smov %s546_s18  ;;  %18 = sbr.rel (!%p16_p4) target bundleno = 5 (0x5), region = 77 }
 0x365   :  { %276 = vsyncpa [#allocation3], 1 }
 0x366   :  { %278 = vsyncpa [#allocation3 + $0x1], 1 }
 0x367   :  { %279 = vsyncpa [#allocation4], 1 }
 0x368   :  { %281 = vsyncpa [#allocation4 + $0x1], 1 }

</bundles_post_ra>
